<compile_context>
chip_gen: v6e
topology: v6e:2x2x1
jax: 0.10.0
libtpu: 0.0.40
codegen_flags: <defaults>
</compile_context>

<pallas_src>
import functools

import jax
import jax.numpy as jnp
from jax.experimental import pallas as pl
from jax.experimental.pallas import tpu as pltpu


def _focal_ce_sum_kernel(t_ref, x_ref, o_ref, *, n_total, block_rows,
                         steps_per_split):
    split = pl.program_id(0)      # parallel axis (per-TensorCore on v7x)
    j = pl.program_id(1)          # inner streaming / reduction axis

    @pl.when(j == 0)
    def _():
        o_ref[...] = jnp.zeros_like(o_ref)

    x = x_ref[...].astype(jnp.float32)                 # (TN, C) logits
    t = t_ref[...]                                     # (TN, 1) int32 targets

    # Global row index of each row in this tile; mask rows past the batch
    # (partial last tile, or duplicated clamped block of the second split).
    row = jax.lax.broadcasted_iota(jnp.int32, (x.shape[0], 1), dimension=0)
    global_row = (split * steps_per_split + j) * block_rows + row
    valid = global_row < n_total                       # (TN, 1) bool

    # Zero invalid rows BEFORE any transcendental so garbage VMEM never
    # produces Inf/NaN inside the reduction.
    x = jnp.where(valid, x, 0.0)

    # Numerically-stable per-row logsumexp (2 cross-lane reduces per strip).
    m = jnp.max(x, axis=-1, keepdims=True)                               # (TN,1)
    lse = m + jnp.log(jnp.sum(jnp.exp(x - m), axis=-1, keepdims=True))   # (TN,1)

    # Target logit selection: only the tile-wide SUM is needed, so use a
    # full-tile masked sum (VALU adds + one final reduce) instead of a
    # per-row cross-lane reduce.
    col = jax.lax.broadcasted_iota(jnp.int32, x.shape, dimension=1)       # (TN,C)
    picked_sum = jnp.sum(jnp.where((col == t) & valid, x, 0.0),
                         keepdims=True)                                   # (1,1)
    lse_sum = jnp.sum(jnp.where(valid, lse, 0.0), keepdims=True)          # (1,1)

    # Raw CE partial sum for this split, accumulated in the resident output.
    o_ref[...] = o_ref[...] + (lse_sum - picked_sum)


def _sublane_multiple(dtype):
    # 8 for f32, 16 for bf16, 32 for int8/fp8.
    return max(8, 32 // jnp.dtype(dtype).itemsize)


def _pick_tiling(c, dtype):
    """Returns (max_rows_per_tile, vmem_capacity_bytes)."""
    itemsize = jnp.dtype(dtype).itemsize
    sub = _sublane_multiple(dtype)

    try:
        info = pltpu.get_tpu_info()
        vmem_cap = int(getattr(info, "vmem_capacity_bytes", 64 * 1024 * 1024))
    except Exception:
        vmem_cap = 64 * 1024 * 1024         # v7x-safe default

    # Budget for the double-buffered input tiles: ~half of physical VMEM,
    # capped for 128 MiB parts.
    pipeline_budget = min(vmem_cap // 2, 72 * 1024 * 1024)

    # Per-row VMEM footprint: logits row + lane-padded (x128) int32 target row.
    per_row_bytes = c * itemsize + 128 * 4
    max_rows = pipeline_budget // (2 * per_row_bytes)            # double-buffered
    # Additionally cap each logits buffer at ~16 MiB.
    max_rows = min(max_rows, (16 * 1024 * 1024) // max(1, c * itemsize))
    max_rows = max(sub, (max_rows // sub) * sub)                 # dtype sublane rule
    return max_rows, vmem_cap


def focal_loss(logits, targets, *, gamma=1.0, alpha=1.0, block_rows=None):
    """logits: (N, C) float, targets: (N,) int. Returns scalar float32."""
    n, c = logits.shape
    itemsize = jnp.dtype(logits.dtype).itemsize
    t2d = targets.astype(jnp.int32).reshape(n, 1)

    max_rows, vmem_cap = _pick_tiling(c, logits.dtype)
    if block_rows is not None:
        tn = block_rows
    elif n <= max_rows:
        tn = n                          # single full-dim block
    else:
        tn = max_rows

    n_blocks = pl.cdiv(n, tn)
    # Two splits so v7x's two TensorCores each take half the batch; on
    # v5e/v6e (1 TC) the parallel axis just runs serially at no extra cost.
    num_splits = 2 if n_blocks >= 2 else 1
    steps_per_split = pl.cdiv(n_blocks, num_splits)
    last_blk = n_blocks - 1

    def row_block(ci, ji):
        # Clamp so a duplicated trailing step never DMAs past the array; its
        # rows are fully masked out inside the kernel via global_row >= n.
        return jnp.minimum(ci * steps_per_split + ji, last_blk)

    kernel = functools.partial(
        _focal_ce_sum_kernel,
        n_total=n, block_rows=tn, steps_per_split=steps_per_split)

    # Declared VMEM limit: double-buffered logits tiles + lane-padded targets
    # tiles + headroom, clamped under the physical capacity.
    footprint = 2 * tn * c * itemsize + 2 * tn * 128 * 4 + 4 * 1024 * 1024
    vmem_limit = int(max(min(footprint, int(vmem_cap * 0.85)),
                         16 * 1024 * 1024))

    partials = pl.pallas_call(
        kernel,
        out_shape=jax.ShapeDtypeStruct((num_splits, 1), jnp.float32),
        grid_spec=pltpu.PrefetchScalarGridSpec(
            num_scalar_prefetch=0,
            grid=(num_splits, steps_per_split),
            in_specs=[
                pl.BlockSpec((tn, 1), lambda ci, ji: (row_block(ci, ji), 0)),
                pl.BlockSpec((tn, c), lambda ci, ji: (row_block(ci, ji), 0)),
            ],
            out_specs=pl.BlockSpec((1, 1), lambda ci, ji: (ci, 0)),
        ),
        compiler_params=pltpu.CompilerParams(
            dimension_semantics=("parallel", "arbitrary"),
            vmem_limit_bytes=vmem_limit,
        ),
    )(t2d, logits)

    # Scalar finalize in plain JAX (reduction='mean' over the global batch,
    # then focal modulation) -- free on a scalar and keeps the kernel a pure
    # streaming CE-sum reduction.
    ce_sum = jnp.sum(partials)
    logp = ce_sum / jnp.float32(n)
    p = jnp.exp(-logp)
    base = jnp.maximum(1.0 - p, 0.0)            # guard fractional gamma
    loss = (base ** jnp.float32(gamma)) * logp * jnp.float32(alpha)
    return 10.0 * loss


def _focal_loss_ref(logits, targets, *, gamma=1.0, alpha=1.0):
    # pure-JAX reference mirroring torch.nn.CrossEntropyLoss(reduction='mean')
    logits = logits.astype(jnp.float32)
    lse = jax.scipy.special.logsumexp(logits, axis=-1)
    picked = jnp.take_along_axis(
        logits, targets[:, None].astype(jnp.int32), axis=-1)[:, 0]
    logp = jnp.mean(lse - picked)
    p = jnp.exp(-logp)
    return 10.0 * ((1.0 - p) ** gamma) * logp * alpha


if __name__ == "__main__":
    key = jax.random.PRNGKey(0)
    k1, k2, k3, k4 = jax.random.split(key, 4)

    # Test 1: small shape matching the module's intended use (batch=8, classes=16).
    N, C = 8, 16
    logits = jax.random.normal(k1, (N, C), dtype=jnp.float32)
    targets = jax.random.randint(k2, (N,), 0, C, dtype=jnp.int32)

    out = jax.block_until_ready(focal_loss(logits, targets, gamma=1.0, alpha=1.0))
    ref = _focal_loss_ref(logits, targets, gamma=1.0, alpha=1.0)
    assert jnp.allclose(out, ref, atol=1e-5, rtol=1e-5), (out, ref)

    # Test 2: exercise the tiled grid, the 2-way parallel split, the clamped
    # duplicate trailing block, and the partial-last-tile mask path.
    N2, C2 = 20, 128
    logits2 = jax.random.normal(k3, (N2, C2), dtype=jnp.float32)
    targets2 = jax.random.randint(k4, (N2,), 0, C2, dtype=jnp.int32)

    out2 = jax.block_until_ready(
        focal_loss(logits2, targets2, gamma=1.0, alpha=1.0, block_rows=8))
    ref2 = _focal_loss_ref(logits2, targets2, gamma=1.0, alpha=1.0)
    assert jnp.allclose(out2, ref2, atol=1e-5, rtol=1e-5), (out2, ref2)

    print("KERNEL_OK")
</pallas_src>

<mosaic_0001>
module attributes {stable_mosaic.version = 11 : i64} {
  func.func @_focal_ce_sum_kernel(%arg0: i32, %arg1: i32, %arg2: memref<8x1xi32, #tpu.memory_space<vmem>>, %arg3: memref<8x16xf32, #tpu.memory_space<vmem>>, %arg4: memref<1x1xf32, #tpu.memory_space<vmem>>) attributes {dimension_semantics = [#tpu.dimension_semantics<parallel>, #tpu.dimension_semantics<arbitrary>], iteration_bounds = array<i64: 1, 1>, scalar_prefetch = 0 : i64, scratch_operands = 0 : i64, tpu.core_type = #tpu.core_type<tc>, window_params = [{transform_indices = @transform_0, window_bounds = array<i64: 8, 1>}, {transform_indices = @transform_1, window_bounds = array<i64: 8, 16>}, {transform_indices = @transform_2, window_bounds = array<i64: 1, 1>}]} {
    %c0_i32 = arith.constant 0 : i32
    %0 = arith.cmpi eq, %arg1, %c0_i32 : i32
    %1 = arith.extui %0 : i1 to i32
    %c0_i32_0 = arith.constant 0 : i32
    %2 = arith.cmpi ne, %1, %c0_i32_0 : i32
    scf.if %2 {
      %cst_15 = arith.constant 0.000000e+00 : f32
      %49 = vector.broadcast %cst_15 : f32 to vector<1x1xf32>
      %c0_16 = arith.constant 0 : index
      %c0_17 = arith.constant 0 : index
      %50 = vector.load %arg4[%c0_16, %c0_17] : memref<1x1xf32, #tpu.memory_space<vmem>>, vector<1x1xf32>
      tpu.vector_store %arg4[%c0_16, %c0_17], %49 {strides = array<i32>} : memref<1x1xf32, #tpu.memory_space<vmem>>, vector<1x1xf32>,
    } else {
    }
    %c0 = arith.constant 0 : index
    %c0_1 = arith.constant 0 : index
    %3 = vector.load %arg3[%c0, %c0_1] : memref<8x16xf32, #tpu.memory_space<vmem>>, vector<8x16xf32>
    %c0_2 = arith.constant 0 : index
    %c0_3 = arith.constant 0 : index
    %4 = vector.load %arg2[%c0_2, %c0_3] : memref<8x1xi32, #tpu.memory_space<vmem>>, vector<8x1xi32>
    %5 = tpu.iota {dimensions = array<i32: 0>} : vector<8x1xi32>
    %c1_i32 = arith.constant 1 : i32
    %6 = arith.muli %arg0, %c1_i32 : i32
    %7 = arith.addi %6, %arg1 : i32
    %c8_i32 = arith.constant 8 : i32
    %8 = arith.muli %7, %c8_i32 : i32
    %9 = vector.broadcast %8 : i32 to vector<8x1xi32>
    %10 = arith.addi %9, %5 : vector<8x1xi32>
    %c8_i32_4 = arith.constant 8 : i32
    %11 = vector.broadcast %c8_i32_4 : i32 to vector<8x1xi32>
    %12 = arith.cmpi slt, %10, %11 : vector<8x1xi32>
    %cst = arith.constant 0.000000e+00 : f32
    %13 = vector.shape_cast %12 : vector<8x1xi1> to vector<8x1xi1>
    %14 = vector.broadcast %13 : vector<8x1xi1> to vector<8x16xi1>
    %15 = vector.broadcast %cst : f32 to vector<8x16xf32>
    %16 = arith.select %14, %3, %15 : vector<8x16xi1>, vector<8x16xf32>
    %cst_5 = arith.constant dense<0xFF800000> : vector<8xf32>
    %17 = vector.multi_reduction <maximumf>, %16, %cst_5 [1] : vector<8x16xf32> to vector<8xf32>
    %18 = vector.shape_cast %17 : vector<8xf32> to vector<8x1xf32>
    %19 = vector.broadcast %18 : vector<8x1xf32> to vector<8x16xf32>
    %20 = arith.subf %16, %19 : vector<8x16xf32>
    %21 = math.exp %20 : vector<8x16xf32>
    %cst_6 = arith.constant dense<0.000000e+00> : vector<8xf32>
    %22 = vector.multi_reduction <add>, %21, %cst_6 [1] : vector<8x16xf32> to vector<8xf32>
    %23 = vector.shape_cast %22 : vector<8xf32> to vector<8x1xf32>
    %24 = math.log %23 : vector<8x1xf32>
    %25 = arith.addf %18, %24 : vector<8x1xf32>
    %26 = tpu.iota {dimensions = array<i32: 1>} : vector<8x16xi32>
    %27 = vector.broadcast %4 : vector<8x1xi32> to vector<8x16xi32>
    %28 = arith.cmpi eq, %26, %27 : vector<8x16xi32>
    %29 = vector.broadcast %12 : vector<8x1xi1> to vector<8x16xi1>
    %30 = arith.andi %28, %29 : vector<8x16xi1>
    %cst_7 = arith.constant 0.000000e+00 : f32
    %31 = vector.broadcast %cst_7 : f32 to vector<8x16xf32>
    %32 = arith.select %30, %16, %31 : vector<8x16xi1>, vector<8x16xf32>
    %33 = vector.shape_cast %32 : vector<8x16xf32> to vector<1x8x16xf32>
    %cst_8 = arith.constant dense<0.000000e+00> : vector<1xf32>
    %34 = vector.multi_reduction <add>, %33, %cst_8 [1, 2] : vector<1x8x16xf32> to vector<1xf32>
    %35 = vector.shape_cast %34 : vector<1xf32> to vector<1x1x1xf32>
    %36 = vector.extract %35[0, 0, 0] : f32 from vector<1x1x1xf32>
    %37 = vector.broadcast %36 : f32 to vector<1x1xf32>
    %cst_9 = arith.constant 0.000000e+00 : f32
    %38 = vector.broadcast %cst_9 : f32 to vector<8x1xf32>
    %39 = arith.select %12, %25, %38 : vector<8x1xi1>, vector<8x1xf32>
    %40 = vector.shape_cast %39 : vector<8x1xf32> to vector<1x8x1xf32>
    %cst_10 = arith.constant dense<0.000000e+00> : vector<1xf32>
    %41 = vector.multi_reduction <add>, %40, %cst_10 [1, 2] : vector<1x8x1xf32> to vector<1xf32>
    %42 = vector.shape_cast %41 : vector<1xf32> to vector<1x1x1xf32>
    %43 = vector.extract %42[0, 0, 0] : f32 from vector<1x1x1xf32>
    %44 = vector.broadcast %43 : f32 to vector<1x1xf32>
    %c0_11 = arith.constant 0 : index
    %c0_12 = arith.constant 0 : index
    %45 = vector.load %arg4[%c0_11, %c0_12] : memref<1x1xf32, #tpu.memory_space<vmem>>, vector<1x1xf32>
    %46 = arith.subf %44, %37 : vector<1x1xf32>
    %47 = arith.addf %45, %46 : vector<1x1xf32>
    %c0_13 = arith.constant 0 : index
    %c0_14 = arith.constant 0 : index
    %48 = vector.load %arg4[%c0_13, %c0_14] : memref<1x1xf32, #tpu.memory_space<vmem>>, vector<1x1xf32>
    tpu.vector_store %arg4[%c0_13, %c0_14], %47 {strides = array<i32>} : memref<1x1xf32, #tpu.memory_space<vmem>>, vector<1x1xf32>,
    return
  }
  func.func @transform_0(%arg0: i32, %arg1: i32) -> (i32, i32) {
    %c1_i32 = arith.constant 1 : i32
    %0 = arith.muli %arg0, %c1_i32 : i32
    %1 = arith.addi %0, %arg1 : i32
    %c0_i32 = arith.constant 0 : i32
    %2 = arith.minsi %1, %c0_i32 : i32
    %c0_i32_0 = arith.constant 0 : i32
    %c0_i32_1 = arith.constant 0 : i32
    return %2, %c0_i32_0 : i32, i32
  }
  func.func @transform_1(%arg0: i32, %arg1: i32) -> (i32, i32) {
    %c1_i32 = arith.constant 1 : i32
    %0 = arith.muli %arg0, %c1_i32 : i32
    %1 = arith.addi %0, %arg1 : i32
    %c0_i32 = arith.constant 0 : i32
    %2 = arith.minsi %1, %c0_i32 : i32
    %c0_i32_0 = arith.constant 0 : i32
    %c0_i32_1 = arith.constant 0 : i32
    return %2, %c0_i32_0 : i32, i32
  }
  func.func @transform_2(%arg0: i32, %arg1: i32) -> (i32, i32) {
    %c0_i32 = arith.constant 0 : i32
    %c0_i32_0 = arith.constant 0 : i32
    return %arg0, %c0_i32 : i32, i32
  }
}

</mosaic_0001>

<bundles_post_ra>
// kernel: tpu_custom_call.1
= control target key start
LH: loop header
LB: loop body
LE: loop exit
PB: predicated region body
PF: predicated region fallthrough
CT: control target
= control target key end

     0   :  { %vm84_vm0 = vcmask 130048   ;;  %s227_s0 = inlined_call_operand.vmem [shape: s32[8,1], index: 0, kind: input, shape index: {}]   ;;  %s228_s1 = inlined_call_operand.vmem [shape: f32[8,16], index: 1, kind: input, shape index: {}]   ;;  %s229_s2 = inlined_call_operand.hbm [shape: f32[1,1], index: 2, kind: output, shape index: {}]  }
   0x1   :  { %v72_v0 = vld [vmem:[%s228_s1] sm:$0xff] }
   0x2   :  { %7 = vsyncpa [#allocation3], 0  ;;  %v85_v1 = vsel %vm84_vm0, %v72_v0, -inf  ;;  %v73_v2 = vld [vmem:[%s227_s0] sm:$0xff]  ;;  %v195_v3 = vmov 0   ;;  %v97_v9 = vlaneseq  ;;  %vm117_vm2 = vcmask 7168  }
   0x3   :  { %86 = vmax.xlane.f32.xlu0 %v85_v1  ;;  %167 = vset.pattern.permute.xlu1 %v195_v3  ;;  %vm70_vm3 = vcmask 0   ;;  %v196_v26 = vmov 0.0   ;;  %s197_s13 = smov [#allocation2]  }
   0x4   :  { %168 = vset.pattern.permute.xlu0 %v195_v3  ;;  %100 = vperm.xlu1 %167, %v73_v2   ;;  %v98_v10 = vand.u32 127, %v97_v9  ;;  %71 = vst.msk [vmem:[#allocation2] sm:$0x1] %vm70_vm3, %v196_v26  ;;  %s140_s14 = sshll.u32 %s197_s13, 4  ;;  %s141_s14 = int_to_ptr.vmem [resolvable:$true] %s140_s14 }
   0x5   :  { %s173_s15 = scalar_lea.vmem %s141_s14, 16  ;;  %s177_s16 = scalar_lea.vmem %s141_s14, 32 }
   0x6   :  { %p174_p0 = scmp.ne.s32.totalorder %s141_s14, %s173_s15  ;;  %p178_p1 = scmp.lt.s32.totalorder %s141_s14, %s141_s14 }
   0x7   :  { %p179_p2 = scmp.lt.s32.totalorder %s177_s16, %s173_s15 }
   0x9   :  { %p180_p3 = por %p179_p2, %p178_p1 }
   0xb   :  { %v129_v36 = vld [vmem:[#allocation2] sm:$0x1]  ;;  %p181_p4 = pnand %p180_p3, %p174_p0 }
  0x7f   :  { %v101_v11 = vpop.permute.xlu1 %100 }
  0x80   :  { %vm102_vm1 = vcmp.eq.s32.totalorder %v98_v10, %v101_v11 }
  0x81   :  { %v104_v12 = vsel %vm102_vm1, %v72_v0, 0.0 }
  0x82   :  { %v105_v13 = vsel %vm84_vm0, %v104_v12, 0.0 }
  0x83   :  { %106 = vadd.xlane.f32.xlu1 %v105_v13 }
  0x8c   :  { %v87_v4 = vpop.xlane.xlu0 %86 }
  0x8d   :  { %v88_v5 = vsub.f32 %v72_v0, %v87_v4 }
  0x8f   :  { %v89_v6 = vmul.f32 1.442695, %v88_v5 }
  0x91   :  { %169 = vpow2.f32 %v89_v6 }
  0x9e   :  { %v170_v7 = vpop.eup %169 }
  0x9f   :  { %v91_v8 = vsel %vm84_vm0, %v170_v7, 0.0 }
  0xa0   :  { %92 = vadd.xlane.f32.xlu0 %v91_v8 }
 0x10c   :  { %v107_v19 = vpop.xlane.xlu1 %106 }
 0x10d   :  { %v108_v20 = vrot.slane %v107_v19, 4 }
 0x10f   :  { %v109_v21 = vadd.f32 %v108_v20, %v107_v19 }
 0x111   :  { %v110_v22 = vrot.slane %v109_v21, 2 }
 0x113   :  { %v111_v23 = vadd.f32 %v110_v22, %v109_v21 }
 0x115   :  { %v112_v24 = vrot.slane %v111_v23, 1 }
 0x117   :  { %v113_v25 = vadd.f32 %v112_v24, %v111_v23 }
 0x119   :  { %160 = vpush %v113_v25 }
 0x129   :  { %v93_v14 = vpop.xlane.xlu0 %92 }
 0x12a   :  { %171 = vlog2.f32 %v93_v14 }
 0x137   :  { %v172_v15 = vpop.eup %171 }
 0x138   :  { %v95_v16 = vmul.f32 0.6931472, %v172_v15 }
 0x13a   :  { %v96_v17 = vadd.f32 %v95_v16, %v87_v4 }
 0x13c   :  { %v118_v18 = vsel %vm117_vm2, %v96_v17, 0.0 }
 0x13d   :  { %119 = vadd.xlane.f32.xlu0 %v118_v18 }
 0x14a   :  { %s161_s0 = spop %160 }
 0x14b   :  { %v115_v34 = vstv %s161_s0 }
 0x1c6   :  { %v120_v27 = vpop.xlane.xlu0 %119 }
 0x1c7   :  { %v121_v28 = vrot.slane %v120_v27, 4 }
 0x1c9   :  { %v122_v29 = vadd.f32 %v121_v28, %v120_v27 }
 0x1cb   :  { %v123_v30 = vrot.slane %v122_v29, 2 }
 0x1cd   :  { %v124_v31 = vadd.f32 %v123_v30, %v122_v29 }
 0x1cf   :  { %v125_v32 = vrot.slane %v124_v31, 1 }
 0x1d1   :  { %v126_v33 = vadd.f32 %v125_v32, %v124_v31 }
 0x1d3   :  { %162 = vpush %v126_v33 }
 0x204   :  { %s163_s1 = spop %162 }
 0x205   :  { %v128_v35 = vstv %s163_s1 }
 0x206   :  { %v130_v37 = vsub.f32 %v128_v35, %v115_v34 }
 0x208   :  { %v131_v38 = vadd.f32 %v130_v37, %v129_v36 }
 0x20a   :  { %133 = vst.msk [vmem:[#allocation2] sm:$0x1] %vm70_vm3, %v131_v38 }
 0x20b   :  { %184 = shalt.err (!%p181_p4)
}
 0x20c   :  { %143 = dma.vmem_to_hbm [thread:$0]  %s141_s14, 16, %s229_s2, [#allocation3]  }
 0x20d   :  { %193 = dma.done.wait [#allocation3], 16  }
 0x20e   :  { %194 = vsyncadd [#allocation3], 4294967280 }
 0x20f   :  { %147 = vsyncpa [#allocation3], 1 }

</bundles_post_ra>
